<compile_context>
chip_gen: v5e
topology: v5e:2x2
jax: 0.10.0
libtpu: 0.0.40
codegen_flags: <defaults>
</compile_context>

<pallas_src>
import functools

import jax
import jax.numpy as jnp
from jax.experimental import pallas as pl
from jax.experimental.pallas import tpu as pltpu


def _layernorm_v1_kernel(x_ref, w_ref, b_ref, o_ref, *, eps):
    # x_ref: (TN, C, T_HW) tile; normalize along C (axis=1) per HW column.
    x = x_ref[...].astype(jnp.float32)
    mean = jnp.mean(x, axis=1, keepdims=True)          # (TN, 1, T_HW)
    xm = x - mean                                      # reused (no dup subtract)
    var = jnp.mean(xm * xm, axis=1, keepdims=True)     # biased variance
    inv_std = jax.lax.rsqrt(var + eps)
    y = w_ref[...] * (xm * inv_std) + b_ref[...]       # (1, C, 1) broadcast
    o_ref[...] = y.astype(o_ref.dtype)


def _round_up(v, m):
    return ((v + m - 1) // m) * m


def _cdiv(a, b):
    return (a + b - 1) // b


def _largest_divisor_leq(n, cap):
    cap = max(1, min(n, cap))
    for d in range(cap, 0, -1):
        if n % d == 0:
            return d
    return 1


def _default_vmem_limits():
    """(budget_bytes, vmem_limit_bytes) derived from the actual chip."""
    try:
        cap = int(pltpu.get_tpu_info().vmem_capacity_bytes)
    except Exception:
        cap = 64 * 1024 * 1024  # conservative: v7x per-TC VMEM
    budget = min(int(cap * 0.65), 64 * 1024 * 1024)   # ~41 MiB on v7x, 64 MiB on v5e/v6e
    limit = min(int(cap * 0.85), budget + 16 * 1024 * 1024)
    return budget, max(limit, budget)


def layer_norm_v1(x, weight=None, bias=None, eps=1e-6,
                  target_block_bytes=2 * 1024 * 1024,
                  vmem_budget_bytes=None, vmem_limit_bytes=None):
    """x: (N, C, H, W); weight, bias: (1, C, 1) or None. Normalize along C."""
    N, C, H, W = x.shape
    HW = H * W

    # affine=False is equivalent to weight=1, bias=0.
    if weight is None:
        weight = jnp.ones((1, C, 1), dtype=jnp.float32)
    if bias is None:
        bias = jnp.zeros((1, C, 1), dtype=jnp.float32)

    out_dtype = jnp.result_type(x.dtype, weight.dtype, bias.dtype)
    in_it = jnp.dtype(x.dtype).itemsize
    out_it = jnp.dtype(out_dtype).itemsize

    def_budget, def_limit = _default_vmem_limits()
    if vmem_budget_bytes is None:
        vmem_budget_bytes = def_budget
    if vmem_limit_bytes is None:
        vmem_limit_bytes = max(def_limit, int(vmem_budget_bytes))

    # VMEM accounting per HW column of one block:
    #   double-buffered input + output blocks (own dtypes) + ~3 f32 temporaries
    #   (x_f32, x-mean, y).  Plus the lane-padded resident f32 weight/bias.
    per_col = C * (2 * in_it + 2 * out_it + 3 * 4)
    wb_resident = 2 * _round_up(C, 8) * 128 * 4
    avail = max(0, int(vmem_budget_bytes) - wb_resident)

    # Lane tile: ~target bytes per input block, at least 512 lanes when the
    # budget allows, multiple of 128, capped by budget and the HW extent.
    target_t = max(128, (target_block_bytes // max(1, C * in_it)) // 128 * 128)
    max_t = max(128, (avail // per_col) // 128 * 128)
    t_hw = max(128, min(_round_up(HW, 128), max(512, target_t), max_t))
    hw_tiles = _cdiv(HW, t_hw)

    # Batch the leading axis when a single HW tile covers a row and blocks
    # would otherwise be tiny (avoids being bound by ~0.35 us fixed step cost).
    tn = 1
    if hw_tiles == 1 and N > 1:
        blk_bytes = C * t_hw * in_it
        tn_cap = min(N,
                     max(1, target_block_bytes // max(1, blk_bytes)),
                     max(1, avail // max(1, per_col * t_hw)))
        tn = _largest_divisor_leq(N, tn_cap)

    # Megacore: for real work (>2 MiB) expose >=4 parallel grid steps so both
    # TensorCores on v7x get iterations even at small batch.
    total_bytes = N * C * HW * in_it
    while ((N // tn) * _cdiv(HW, t_hw) < 4 and t_hw > 128
           and total_bytes > 2 * 1024 * 1024):
        t_hw = max(128, ((t_hw // 2) // 128) * 128)
    hw_tiles = _cdiv(HW, t_hw)

    grid = (N // tn, hw_tiles)

    # NCHW -> (N, C, HW) is a free metadata reshape; NO padding, NO final slice.
    x3 = x.reshape(N, C, HW)
    w32 = weight.reshape(1, C, 1).astype(jnp.float32)
    b32 = bias.reshape(1, C, 1).astype(jnp.float32)

    cost = pl.CostEstimate(
        flops=7 * N * C * HW,
        transcendentals=N * HW,
        bytes_accessed=N * C * HW * (in_it + out_it) + 2 * C * 4,
    )

    kernel = functools.partial(_layernorm_v1_kernel, eps=eps)

    out3 = pl.pallas_call(
        kernel,
        out_shape=jax.ShapeDtypeStruct((N, C, HW), out_dtype),
        grid_spec=pltpu.PrefetchScalarGridSpec(
            num_scalar_prefetch=0,
            grid=grid,
            in_specs=[
                pl.BlockSpec((tn, C, t_hw), lambda n, t: (n, 0, t)),
                pl.BlockSpec((1, C, 1), lambda n, t: (0, 0, 0)),
                pl.BlockSpec((1, C, 1), lambda n, t: (0, 0, 0)),
            ],
            out_specs=pl.BlockSpec((tn, C, t_hw), lambda n, t: (n, 0, t)),
        ),
        compiler_params=pltpu.CompilerParams(
            dimension_semantics=("parallel", "parallel"),
            vmem_limit_bytes=int(vmem_limit_bytes),
        ),
        cost_estimate=cost,
    )(x3, w32, b32)

    return out3.reshape(N, C, H, W)


if __name__ == "__main__":
    key = jax.random.PRNGKey(0)
    N, C, H, W = 2, 4, 16, 16

    x = jax.random.normal(key, (N, C, H, W), dtype=jnp.float32)
    # Matches nn.Parameter(torch.ones(1, C, 1)) / torch.zeros(1, C, 1)
    weight = jnp.ones((1, C, 1), dtype=jnp.float32)
    bias = jnp.zeros((1, C, 1), dtype=jnp.float32)

    out = layer_norm_v1(x, weight, bias, eps=1e-6)
    out = jax.block_until_ready(out)

    # Reference (same semantics as the PyTorch module: biased var, eps inside rsqrt)
    x3 = x.reshape(N, C, H * W)
    mean = x3.mean(axis=1, keepdims=True)
    var = ((x3 - mean) ** 2).mean(axis=1, keepdims=True)
    ref = (x3 - mean) * jax.lax.rsqrt(var + 1e-6)
    ref = (weight * ref + bias).reshape(N, C, H, W)
    assert out.shape == ref.shape and out.dtype == ref.dtype
    assert jnp.allclose(out, ref, atol=1e-5, rtol=1e-5)

    print("KERNEL_OK")
</pallas_src>

<mosaic_0001>
module attributes {stable_mosaic.version = 11 : i64} {
  func.func @_layernorm_v1_kernel(%arg0: i32, %arg1: i32, %arg2: memref<2x4x256xf32, #tpu.memory_space<vmem>>, %arg3: memref<1x4x1xf32, #tpu.memory_space<vmem>>, %arg4: memref<1x4x1xf32, #tpu.memory_space<vmem>>, %arg5: memref<2x4x256xf32, #tpu.memory_space<vmem>>) attributes {dimension_semantics = [#tpu.dimension_semantics<parallel>, #tpu.dimension_semantics<parallel>], iteration_bounds = array<i64: 1, 1>, scalar_prefetch = 0 : i64, scratch_operands = 0 : i64, tpu.core_type = #tpu.core_type<tc>, window_params = [{transform_indices = @transform_0, window_bounds = array<i64: 2, 4, 256>}, {pipeline_mode = #tpu.pipeline_mode<synchronous>, transform_indices = @transform_1, window_bounds = array<i64: 1, 4, 1>}, {pipeline_mode = #tpu.pipeline_mode<synchronous>, transform_indices = @transform_2, window_bounds = array<i64: 1, 4, 1>}, {transform_indices = @transform_3, window_bounds = array<i64: 2, 4, 256>}]} {
    %c0 = arith.constant 0 : index
    %c0_0 = arith.constant 0 : index
    %c0_1 = arith.constant 0 : index
    %0 = vector.load %arg2[%c0, %c0_0, %c0_1] : memref<2x4x256xf32, #tpu.memory_space<vmem>>, vector<2x4x256xf32>
    %cst = arith.constant dense<0.000000e+00> : vector<2x256xf32>
    %1 = vector.multi_reduction <add>, %0, %cst [1] : vector<2x4x256xf32> to vector<2x256xf32>
    %2 = vector.shape_cast %1 : vector<2x256xf32> to vector<2x1x256xf32>
    %cst_2 = arith.constant 4.000000e+00 : f32
    %3 = vector.broadcast %cst_2 : f32 to vector<2x1x256xf32>
    %4 = arith.divf %2, %3 : vector<2x1x256xf32>
    %5 = vector.broadcast %4 : vector<2x1x256xf32> to vector<2x4x256xf32>
    %6 = arith.subf %0, %5 : vector<2x4x256xf32>
    %7 = arith.mulf %6, %6 : vector<2x4x256xf32>
    %cst_3 = arith.constant dense<0.000000e+00> : vector<2x256xf32>
    %8 = vector.multi_reduction <add>, %7, %cst_3 [1] : vector<2x4x256xf32> to vector<2x256xf32>
    %9 = vector.shape_cast %8 : vector<2x256xf32> to vector<2x1x256xf32>
    %cst_4 = arith.constant 4.000000e+00 : f32
    %10 = vector.broadcast %cst_4 : f32 to vector<2x1x256xf32>
    %11 = arith.divf %9, %10 : vector<2x1x256xf32>
    %cst_5 = arith.constant 9.99999997E-7 : f32
    %12 = vector.broadcast %cst_5 : f32 to vector<2x1x256xf32>
    %13 = arith.addf %11, %12 : vector<2x1x256xf32>
    %14 = math.rsqrt %13 : vector<2x1x256xf32>
    %c0_6 = arith.constant 0 : index
    %c0_7 = arith.constant 0 : index
    %c0_8 = arith.constant 0 : index
    %15 = vector.load %arg3[%c0_6, %c0_7, %c0_8] : memref<1x4x1xf32, #tpu.memory_space<vmem>>, vector<1x4x1xf32>
    %16 = vector.broadcast %14 : vector<2x1x256xf32> to vector<2x4x256xf32>
    %17 = arith.mulf %6, %16 : vector<2x4x256xf32>
    %18 = vector.broadcast %15 : vector<1x4x1xf32> to vector<2x4x256xf32>
    %19 = arith.mulf %18, %17 : vector<2x4x256xf32>
    %c0_9 = arith.constant 0 : index
    %c0_10 = arith.constant 0 : index
    %c0_11 = arith.constant 0 : index
    %20 = vector.load %arg4[%c0_9, %c0_10, %c0_11] : memref<1x4x1xf32, #tpu.memory_space<vmem>>, vector<1x4x1xf32>
    %21 = vector.broadcast %20 : vector<1x4x1xf32> to vector<2x4x256xf32>
    %22 = arith.addf %19, %21 : vector<2x4x256xf32>
    %c0_12 = arith.constant 0 : index
    %c0_13 = arith.constant 0 : index
    %c0_14 = arith.constant 0 : index
    %23 = vector.load %arg5[%c0_12, %c0_13, %c0_14] : memref<2x4x256xf32, #tpu.memory_space<vmem>>, vector<2x4x256xf32>
    tpu.vector_store %arg5[%c0_12, %c0_13, %c0_14], %22 {strides = array<i32>} : memref<2x4x256xf32, #tpu.memory_space<vmem>>, vector<2x4x256xf32>,
    return
  }
  func.func @transform_0(%arg0: i32, %arg1: i32) -> (i32, i32, i32) {
    %c0_i32 = arith.constant 0 : i32
    %c0_i32_0 = arith.constant 0 : i32
    return %arg0, %c0_i32, %arg1 : i32, i32, i32
  }
  func.func @transform_1(%arg0: i32, %arg1: i32) -> (i32, i32, i32) {
    %c0_i32 = arith.constant 0 : i32
    %c0_i32_0 = arith.constant 0 : i32
    %c0_i32_1 = arith.constant 0 : i32
    %c0_i32_2 = arith.constant 0 : i32
    return %c0_i32, %c0_i32_0, %c0_i32_1 : i32, i32, i32
  }
  func.func @transform_2(%arg0: i32, %arg1: i32) -> (i32, i32, i32) {
    %c0_i32 = arith.constant 0 : i32
    %c0_i32_0 = arith.constant 0 : i32
    %c0_i32_1 = arith.constant 0 : i32
    %c0_i32_2 = arith.constant 0 : i32
    return %c0_i32, %c0_i32_0, %c0_i32_1 : i32, i32, i32
  }
  func.func @transform_3(%arg0: i32, %arg1: i32) -> (i32, i32, i32) {
    %c0_i32 = arith.constant 0 : i32
    %c0_i32_0 = arith.constant 0 : i32
    return %arg0, %c0_i32, %arg1 : i32, i32, i32
  }
}

</mosaic_0001>

<bundles_post_ra>
// kernel: tpu_custom_call.1
= control target key start
LH: loop header
LB: loop body
LE: loop exit
PB: predicated region body
PF: predicated region fallthrough
CT: control target
= control target key end

     0   :  { %8 = vsyncpa [#allocation3], 0  ;;  %s414_s0 = inlined_call_operand.hbm [shape: f32[2,4,256], index: 0, kind: input, shape index: {}]   ;;  %s415_s1 = inlined_call_operand.vmem [shape: f32[1,4,1], index: 1, kind: input, shape index: {}]   ;;  %s416_s2 = inlined_call_operand.vmem [shape: f32[1,4,1], index: 2, kind: input, shape index: {}]   ;;  %s417_s3 = inlined_call_operand.hbm [shape: f32[2,4,256], index: 3, kind: output, shape index: {}]  }
   0x1   :  { %9 = vsyncpa [#allocation4], 0  ;;  %s14_s14 = sshll.u32 %s414_s0, 4  ;;  %s334_s15 = smov [#allocation2]   ;;  %s15_s14 = int_to_ptr.hbm [resolvable:$true] %s14_s14 }
   0x2   :  { %s16_s16 = sshll.u32 %s334_s15, 4  ;;  %s335_s17 = smov 128   ;;  %s17_s16 = int_to_ptr.vmem [resolvable:$true] %s16_s16 }
   0x3   :  { %s336_s18 = smov 8  }
   0x4   :  { %22 = dma.hbm_to_vmem [thread:$0]  %s15_s14, 256, %s17_s16, [#allocation3], %s335_s17, %s335_s17, %s336_s18  }
   0x5   :  { %330 = dma.done.wait [#allocation3], 256  }
   0x6   :  { %331 = vsyncadd [#allocation3], 4294967040  ;;  %v337_v0 = vmov 0   ;;  %v189_v1 = vld [vmem:[%s415_s1] sm:$0xf]  ;;  %v31_v2 = vld [vmem:[#allocation2] sm:$0xff] }
   0x7   :  { %271 = vset.pattern.permute.xlu0 %v337_v0  ;;  %v32_v3 = vld [vmem:[#allocation2 + $0x8] sm:$0xff]  ;;  %35 = vst [vmem:[#allocation1] ss:$2 sm:$0xff] %v31_v2  ;;  %v338_v4 = vmov 4.0   ;;  %v224_v5 = vld [vmem:[%s416_s2] sm:$0xf] }
   0x8   :  { %204 = vperm.xlu0 %271, %v189_v1   ;;  %39 = vst [vmem:[#allocation1 + $0x10] ss:$2 sm:$0xff] %v32_v3  ;;  %272 = vrcp.f32 %v338_v4  ;;  %vm46_vm0 = vcmask 1043456   ;;  %s339_s1 = smov [#allocation5]   ;;  %s252_s24 = sshll.u32 %s417_s3, 4  ;;  %s253_s24 = int_to_ptr.hbm [resolvable:$true] %s252_s24 }
   0x9   :  { %s250_s2 = sshll.u32 %s339_s1, 4  ;;  %s251_s2 = int_to_ptr.vmem [resolvable:$true] %s250_s2 }
   0xe   :  { %v36_v6 = vld.sshfl [vmem:[#allocation1] sm:$0xff pattern:$0x75316420]  ;;  %v37_v7 = vld.sshfl [vmem:[#allocation1 + $0x8] sm:$0xff pattern:$0x75316420]  ;;  %v273_v8 = vpop.eup %272 }
   0xf   :  { %v40_v9 = vld.sshfl [vmem:[#allocation1 + $0x10] sm:$0xff pattern:$0x75316420]  ;;  %v41_v10 = vld.sshfl [vmem:[#allocation1 + $0x18] sm:$0xff pattern:$0x75316420]  ;;  %vm80_vm1 = vweird.f32 %v273_v8 }
  0x10   :  { %227 = vperm.xlu0 %271, %v224_v5   ;;  %v76_v11 = vmul.f32 4.0, %v273_v8  ;;  %v47_v12 = vsel %vm46_vm0, %v36_v6, 0.0  ;;  %v54_v13 = vsel %vm46_vm0, %v37_v7, 0.0  ;;  %v61_v14 = vsel %vm46_vm0, %v40_v9, 0.0 }
  0x11   :  { %v48_v15 = vrot.slane %v47_v12, 4  ;;  %v55_v16 = vrot.slane %v54_v13, 4  ;;  %v62_v17 = vrot.slane %v61_v14, 4  ;;  %v68_v18 = vsel %vm46_vm0, %v41_v10, 0.0 }
  0x12   :  { %v77_v19 = vsub.f32 1.0, %v76_v11  ;;  %v69_v20 = vrot.slane %v68_v18, 4 }
  0x13   :  { %v49_v21 = vadd.f32 %v48_v15, %v47_v12  ;;  %v56_v22 = vadd.f32 %v55_v16, %v54_v13  ;;  %v63_v23 = vadd.f32 %v62_v17, %v61_v14 }
  0x14   :  { %v78_v24 = vmul.f32 %v273_v8, %v77_v19  ;;  %v70_v25 = vadd.f32 %v69_v20, %v68_v18 }
  0x15   :  { %v50_v26 = vrot.slane %v49_v21, 2  ;;  %v57_v27 = vrot.slane %v56_v22, 2  ;;  %v64_v28 = vrot.slane %v63_v23, 2 }
  0x16   :  { %v79_v29 = vadd.f32 %v273_v8, %v78_v24  ;;  %v71_v30 = vrot.slane %v70_v25, 2 }
  0x17   :  { %v51_v31 = vadd.f32 %v50_v26, %v49_v21  ;;  %v58_v32 = vadd.f32 %v57_v27, %v56_v22  ;;  %v65_v33 = vadd.f32 %v64_v28, %v63_v23 }
  0x18   :  { %v72_v34 = vadd.f32 %v71_v30, %v70_v25  ;;  %v81_v38 = vsel %vm80_vm1, %v273_v8, %v79_v29 }
  0x19   :  { %v52_v35 = vrot.slane %v51_v31, 1  ;;  %v59_v36 = vrot.slane %v58_v32, 1  ;;  %v66_v37 = vrot.slane %v65_v33, 1 }
  0x1a   :  { %v73_v39 = vrot.slane %v72_v34, 1 }
  0x1b   :  { %v53_v40 = vadd.f32 %v52_v35, %v51_v31  ;;  %v60_v41 = vadd.f32 %v59_v36, %v58_v32  ;;  %v67_v42 = vadd.f32 %v66_v37, %v65_v33 }
  0x1c   :  { %v74_v43 = vadd.f32 %v73_v39, %v72_v34 }
  0x1d   :  { %v82_v44 = vmul.f32 %v81_v38, %v53_v40  ;;  %v83_v45 = vmul.f32 %v81_v38, %v60_v41  ;;  %v84_v46 = vmul.f32 %v81_v38, %v67_v42 }
  0x1e   :  { %v85_v47 = vmul.f32 %v81_v38, %v74_v43 }
  0x1f   :  { %v90_v48 = vrot.slane %v83_v45, 4 }
  0x20   :  { %v91_v49 = vrot.slane %v85_v47, 4 }
  0x21   :  { %v92_v50 = vsel %vm46_vm0, %v82_v44, %v90_v48 }
  0x22   :  { %v93_v51 = vsel %vm46_vm0, %v84_v46, %v91_v49  ;;  %v378_v52 = vsub.f32 %v31_v2, %v92_v50 }
  0x23   :  { %v380_v53 = vsub.f32 %v32_v3, %v93_v51 }
  0x24   :  { %v98_v54 = vmul.f32 %v378_v52, %v378_v52 }
  0x25   :  { %v99_v55 = vmul.f32 %v380_v53, %v380_v53 }
  0x26   :  { %102 = vst [vmem:[#allocation1] ss:$2 sm:$0xff] %v98_v54 }
  0x27   :  { %106 = vst [vmem:[#allocation1 + $0x10] ss:$2 sm:$0xff] %v99_v55 }
  0x2d   :  { %v103_v56 = vld.sshfl [vmem:[#allocation1] sm:$0xff pattern:$0x75316420]  ;;  %v104_v57 = vld.sshfl [vmem:[#allocation1 + $0x8] sm:$0xff pattern:$0x75316420] }
  0x2e   :  { %v107_v58 = vld.sshfl [vmem:[#allocation1 + $0x10] sm:$0xff pattern:$0x75316420]  ;;  %v108_v59 = vld.sshfl [vmem:[#allocation1 + $0x18] sm:$0xff pattern:$0x75316420] }
  0x2f   :  { %v113_v60 = vsel %vm46_vm0, %v103_v56, 0.0  ;;  %v120_v61 = vsel %vm46_vm0, %v104_v57, 0.0  ;;  %v127_v62 = vsel %vm46_vm0, %v107_v58, 0.0  ;;  %v134_v63 = vsel %vm46_vm0, %v108_v59, 0.0 }
  0x30   :  { %v114_v0 = vrot.slane %v113_v60, 4  ;;  %v121_v1 = vrot.slane %v120_v61, 4  ;;  %v128_v2 = vrot.slane %v127_v62, 4  ;;  %v135_v3 = vrot.slane %v134_v63, 4 }
  0x32   :  { %v115_v4 = vadd.f32 %v114_v0, %v113_v60  ;;  %v122_v5 = vadd.f32 %v121_v1, %v120_v61  ;;  %v129_v6 = vadd.f32 %v128_v2, %v127_v62  ;;  %v136_v7 = vadd.f32 %v135_v3, %v134_v63 }
  0x34   :  { %v116_v8 = vrot.slane %v115_v4, 2  ;;  %v123_v9 = vrot.slane %v122_v5, 2  ;;  %v130_v10 = vrot.slane %v129_v6, 2  ;;  %v137_v11 = vrot.slane %v136_v7, 2 }
  0x36   :  { %v117_v12 = vadd.f32 %v116_v8, %v115_v4  ;;  %v124_v13 = vadd.f32 %v123_v9, %v122_v5  ;;  %v131_v14 = vadd.f32 %v130_v10, %v129_v6  ;;  %v138_v15 = vadd.f32 %v137_v11, %v136_v7 }
  0x38   :  { %v118_v16 = vrot.slane %v117_v12, 1  ;;  %v125_v17 = vrot.slane %v124_v13, 1  ;;  %v132_v18 = vrot.slane %v131_v14, 1  ;;  %v139_v19 = vrot.slane %v138_v15, 1 }
  0x3a   :  { %v119_v20 = vadd.f32 %v118_v16, %v117_v12  ;;  %v126_v21 = vadd.f32 %v125_v17, %v124_v13  ;;  %v133_v22 = vadd.f32 %v132_v18, %v131_v14  ;;  %v140_v23 = vadd.f32 %v139_v19, %v138_v15 }
  0x3c   :  { %v141_v24 = vmul.f32 %v119_v20, %v81_v38  ;;  %v142_v25 = vmul.f32 %v126_v21, %v81_v38  ;;  %v143_v26 = vmul.f32 %v133_v22, %v81_v38  ;;  %v144_v27 = vmul.f32 %v140_v23, %v81_v38 }
  0x3e   :  { %v145_v28 = vadd.f32 1e-06, %v141_v24  ;;  %v146_v29 = vadd.f32 1e-06, %v142_v25  ;;  %v147_v30 = vadd.f32 1e-06, %v143_v26 }
  0x3f   :  { %v148_v31 = vadd.f32 1e-06, %v144_v27 }
  0x40   :  { %274 = vrsqrt.f32 %v145_v28  ;;  %vm165_vm2 = vweird.f32 %v146_v29  ;;  %vm155_vm4 = vweird.f32 %v145_v28  ;;  %vm175_vm7 = vweird.f32 %v147_v30 }
  0x41   :  { %276 = vrsqrt.f32 %v146_v29  ;;  %vm185_vm8 = vweird.f32 %v148_v31 }
  0x42   :  { %278 = vrsqrt.f32 %v147_v30 }
  0x43   :  { %280 = vrsqrt.f32 %v148_v31 }
  0x46   :  { %v275_v32 = vpop.eup %274 }
  0x47   :  { %v277_v33 = vpop.eup %276  ;;  %v150_v34 = vmul.f32 %v275_v32, %v145_v28  ;;  %vm156_vm5 = vweird.f32 %v275_v32 }
  0x48   :  { %v279_v35 = vpop.eup %278  ;;  %v160_v36 = vmul.f32 %v277_v33, %v146_v29  ;;  %vm166_vm3 = vweird.f32 %v277_v33  ;;  %vm394_vm10 = vmor %vm155_vm4, %vm156_vm5 }
  0x49   :  { %v281_v37 = vpop.eup %280  ;;  %v151_v39 = vmul.f32 %v275_v32, %v150_v34  ;;  %v170_v40 = vmul.f32 %v279_v35, %v147_v30  ;;  %vm390_vm6 = vmor %vm165_vm2, %vm166_vm3  ;;  %vm176_vm11 = vweird.f32 %v279_v35 }
  0x4a   :  { %v161_v41 = vmul.f32 %v277_v33, %v160_v36  ;;  %v180_v42 = vmul.f32 %v281_v37, %v148_v31  ;;  %vm186_vm9 = vweird.f32 %v281_v37  ;;  %vm177_vm13 = vmor %vm175_vm7, %vm176_vm11 }
  0x4b   :  { %v152_v43 = vmul.f32 0.5, %v151_v39  ;;  %v171_v38 = vmul.f32 %v279_v35, %v170_v40  ;;  %vm187_vm12 = vmor %vm185_vm8, %vm186_vm9 }
  0x4c   :  { %v162_v44 = vmul.f32 0.5, %v161_v41  ;;  %v181_v47 = vmul.f32 %v281_v37, %v180_v42 }
  0x4d   :  { %v153_v45 = vsub.f32 1.5, %v152_v43  ;;  %v172_v46 = vmul.f32 0.5, %v171_v38 }
  0x4e   :  { %v163_v48 = vsub.f32 1.5, %v162_v44  ;;  %v182_v55 = vmul.f32 0.5, %v181_v47 }
  0x4f   :  { %v154_v50 = vmul.f32 %v275_v32, %v153_v45  ;;  %v173_v54 = vsub.f32 1.5, %v172_v46 }
  0x50   :  { %v164_v56 = vmul.f32 %v277_v33, %v163_v48  ;;  %v183_v58 = vsub.f32 1.5, %v182_v55 }
  0x51   :  { %v174_v57 = vmul.f32 %v279_v35, %v173_v54  ;;  %v158_v59 = vsel %vm394_vm10, %v275_v32, %v154_v50 }
  0x52   :  { %v168_v60 = vsel %vm390_vm6, %v277_v33, %v164_v56  ;;  %v184_v61 = vmul.f32 %v281_v37, %v183_v58 }
  0x53   :  { %v194_v62 = vrot.slane %v168_v60, 4  ;;  %v178_v63 = vsel %vm177_vm13, %v279_v35, %v174_v57 }
  0x54   :  { %v188_v0 = vsel %vm187_vm12, %v281_v37, %v184_v61 }
  0x55   :  { %v196_v1 = vsel %vm46_vm0, %v158_v59, %v194_v62  ;;  %v195_v2 = vrot.slane %v188_v0, 4 }
  0x56   :  { %v200_v3 = vmul.f32 %v196_v1, %v378_v52 }
  0x57   :  { %v197_v4 = vsel %vm46_vm0, %v178_v63, %v195_v2 }
  0x58   :  { %209 = vst [vmem:[#allocation1] ss:$2 sm:$0xff] %v200_v3  ;;  %v201_v5 = vmul.f32 %v197_v4, %v380_v53 }
  0x5a   :  { %213 = vst [vmem:[#allocation1 + $0x10] ss:$2 sm:$0xff] %v201_v5 }
  0x5f   :  { %v211_v7 = vld.sshfl [vmem:[#allocation1 + $0x8] sm:$0xff pattern:$0x75316420]  ;;  %v210_v9 = vld.sshfl [vmem:[#allocation1] sm:$0xff pattern:$0x75316420] }
  0x61   :  { %v215_v8 = vld.sshfl [vmem:[#allocation1 + $0x18] sm:$0xff pattern:$0x75316420]  ;;  %v214_v10 = vld.sshfl [vmem:[#allocation1 + $0x10] sm:$0xff pattern:$0x75316420] }
  0x7a   :  { %v205_v6 = vpop.permute.xlu0 %204 }
  0x7b   :  { %v221_v11 = vmul.f32 %v211_v7, %v205_v6  ;;  %v223_v12 = vmul.f32 %v215_v8, %v205_v6  ;;  %v220_v14 = vmul.f32 %v210_v9, %v205_v6  ;;  %v222_v15 = vmul.f32 %v214_v10, %v205_v6 }
  0x82   :  { %v228_v13 = vpop.permute.xlu0 %227 }
  0x83   :  { %v231_v16 = vadd.f32 %v228_v13, %v221_v11  ;;  %v233_v17 = vadd.f32 %v228_v13, %v223_v12  ;;  %v230_v52 = vadd.f32 %v228_v13, %v220_v14  ;;  %v232_v53 = vadd.f32 %v228_v13, %v222_v15 }
  0x85   :  { %v238_v18 = vrot.slane %v231_v16, 4  ;;  %v239_v19 = vrot.slane %v233_v17, 4 }
  0x87   :  { %v240_v20 = vsel %vm46_vm0, %v230_v52, %v238_v18  ;;  %v241_v21 = vsel %vm46_vm0, %v232_v53, %v239_v19 }
  0x88   :  { %244 = vst [vmem:[#allocation5] sm:$0xff] %v240_v20 }
  0x89   :  { %245 = vst [vmem:[#allocation5 + $0x8] sm:$0xff] %v241_v21 }
  0x8a   :  { %258 = dma.vmem_to_hbm [thread:$0]  %s251_s2, 256, %s253_s24, [#allocation4], %s335_s17, %s335_s17, %s336_s18  }
  0x8b   :  { %332 = dma.done.wait [#allocation4], 256  }
  0x8c   :  { %333 = vsyncadd [#allocation4], 4294967040 }
  0x8d   :  { %263 = vsyncpa [#allocation3], 1 }
  0x8e   :  { %264 = vsyncpa [#allocation4], 1 }

</bundles_post_ra>
